<compile_context>
chip_gen: v7x
topology: tpu7x:2x2x1
jax: 0.10.0
libtpu: 0.0.40
codegen_flags: <defaults>
</compile_context>

<pallas_src>
import jax
import jax.numpy as jnp
from jax.experimental import pallas as pl
from jax.experimental.pallas import tpu as pltpu


def _broadcast_kernel(w_ref, o_ref):
    # w_ref: (1, l_blk) constant weight slice; o_ref: (b_blk, l_blk) output block.
    # Sublane-broadcast the single weight row across the batch rows of the block.
    o_ref[...] = jnp.broadcast_to(w_ref[...], o_ref.shape)


def _target_block_bytes() -> int:
    """Per-block byte budget.  Larger on v7x (faster HBM -> per-step overhead is a
    bigger fraction of a 2 MiB block); 2 MiB elsewhere (safe on v5e's 16 MiB
    default scoped VMEM)."""
    try:
        kind = jax.devices()[0].device_kind.lower()
    except Exception:
        kind = ""
    if "v7" in kind:
        return 4 << 20
    return 2 << 20


def constant_input_clean(weight: jax.Array, batch_size: int) -> jax.Array:
    """weight: (1, C, H, W) -> output: (batch_size, C, H, W) (batch broadcast)."""
    _, C, H, W = weight.shape
    L = C * H * W
    itemsize = jnp.dtype(weight.dtype).itemsize
    target = _target_block_bytes()

    # Minimum legal batch rows per block (sublane rule: multiple of 8, or full batch).
    b_min = batch_size if batch_size <= 8 else 8

    # Decide whether the lane (flattened C*H*W) axis must be tiled, judged against
    # the *minimum* batch block so the joint block can always be kept <= target.
    need_l_tiling = L * itemsize * b_min > target

    # Unaligned large rows: pad to a multiple of 128 in the wrapper (slice after)
    # rather than forcing an unbounded full-row block.
    L_pad = L
    if need_l_tiling and L % 128 != 0:
        L_pad = pl.cdiv(L, 128) * 128

    # Lane-dense flat view (zero-cost reshape of contiguous memory), padded if needed.
    w_flat = weight.reshape(1, L)
    if L_pad != L:
        w_flat = jnp.pad(w_flat, ((0, 0), (0, L_pad - L)))

    # --- Lane (last-dim) block -------------------------------------------------
    if not need_l_tiling:
        l_blk = L_pad  # full row; b_min * L * itemsize <= target by construction
    else:
        # Budget the lane block against b_min rows so even the smallest legal
        # batch block stays within `target`.  L_pad is 128-aligned here.
        l_blk = (target // (b_min * itemsize)) // 128 * 128
        l_blk = max(128, min(L_pad, l_blk))

    # --- Sublane (batch) block ---------------------------------------------------
    rows_fit = max(1, target // (l_blk * itemsize))
    if batch_size <= 8 or rows_fit >= batch_size:
        b_blk = batch_size
    else:
        b_blk = max(8, (rows_fit // 8) * 8)

    num_l_blocks = pl.cdiv(L_pad, l_blk)
    num_b_blocks = pl.cdiv(batch_size, b_blk)

    out_block_bytes = b_blk * l_blk * itemsize
    in_block_bytes = l_blk * itemsize
    # Explicit scoped-VMEM budget: double-buffered in+out plus compiler headroom.
    vmem_limit = int(
        min(64 << 20, max(8 << 20, 2 * (out_block_bytes + in_block_bytes) + (4 << 20)))
    )

    out_flat = pl.pallas_call(
        _broadcast_kernel,
        out_shape=jax.ShapeDtypeStruct((batch_size, L_pad), weight.dtype),
        grid_spec=pltpu.PrefetchScalarGridSpec(
            num_scalar_prefetch=0,
            # L outer / batch inner: weight block index (0, l) is constant across
            # the inner batch loop, so each weight stripe is fetched exactly once.
            grid=(num_l_blocks, num_b_blocks),
            in_specs=[
                pl.BlockSpec((1, l_blk), lambda l, b: (0, l)),
            ],
            out_specs=pl.BlockSpec((b_blk, l_blk), lambda l, b: (b, l)),
        ),
        compiler_params=pltpu.CompilerParams(
            dimension_semantics=("parallel", "parallel"),
            vmem_limit_bytes=vmem_limit,
        ),
        cost_estimate=pl.CostEstimate(
            flops=0,
            transcendentals=0,
            bytes_accessed=int((batch_size * L + L) * itemsize),
        ),
    )(w_flat)

    if L_pad != L:
        out_flat = out_flat[:, :L]
    return out_flat.reshape(batch_size, C, H, W)


if __name__ == "__main__":
    num_channels = 4
    size = 16
    batch_size = 2

    # Deterministic parameter init (mirrors nn.Parameter(torch.randn(1, C, size, size))).
    key = jax.random.PRNGKey(0)
    weight = jax.random.normal(key, (1, num_channels, size, size), dtype=jnp.float32)

    out = constant_input_clean(weight, batch_size)
    out = jax.block_until_ready(out)

    # Reference check: out must equal weight tiled along batch.
    ref = jnp.broadcast_to(weight, (batch_size, num_channels, size, size))
    assert out.shape == (batch_size, num_channels, size, size)
    assert jnp.array_equal(out, ref)

    print("KERNEL_OK")
</pallas_src>

<mosaic_0001>
module attributes {stable_mosaic.version = 11 : i64} {
  func.func @_broadcast_kernel(%arg0: i32, %arg1: i32, %arg2: memref<1x1024xf32, #tpu.memory_space<vmem>>, %arg3: memref<2x1024xf32, #tpu.memory_space<vmem>>) attributes {dimension_semantics = [#tpu.dimension_semantics<parallel>, #tpu.dimension_semantics<parallel>], iteration_bounds = array<i64: 1, 1>, scalar_prefetch = 0 : i64, scratch_operands = 0 : i64, tpu.core_type = #tpu.core_type<tc>, window_params = [{transform_indices = @transform_0, window_bounds = array<i64: 1, 1024>}, {transform_indices = @transform_1, window_bounds = array<i64: 2, 1024>}]} {
    %c0 = arith.constant 0 : index
    %c0_0 = arith.constant 0 : index
    %0 = vector.load %arg2[%c0, %c0_0] : memref<1x1024xf32, #tpu.memory_space<vmem>>, vector<1x1024xf32>
    %1 = vector.shape_cast %0 : vector<1x1024xf32> to vector<1x1024xf32>
    %2 = vector.broadcast %1 : vector<1x1024xf32> to vector<2x1024xf32>
    %c0_1 = arith.constant 0 : index
    %c0_2 = arith.constant 0 : index
    %3 = vector.load %arg3[%c0_1, %c0_2] : memref<2x1024xf32, #tpu.memory_space<vmem>>, vector<2x1024xf32>
    tpu.vector_store %arg3[%c0_1, %c0_2], %2 {strides = array<i32>} : memref<2x1024xf32, #tpu.memory_space<vmem>>, vector<2x1024xf32>,
    return
  }
  func.func @transform_0(%arg0: i32, %arg1: i32) -> (i32, i32) {
    %c0_i32 = arith.constant 0 : i32
    %c0_i32_0 = arith.constant 0 : i32
    return %c0_i32, %arg0 : i32, i32
  }
  func.func @transform_1(%arg0: i32, %arg1: i32) -> (i32, i32) {
    %c0_i32 = arith.constant 0 : i32
    return %arg1, %arg0 : i32, i32
  }
}

</mosaic_0001>

<bundles_post_ra>
// kernel: tpu_custom_call.1
= control target key start
LH: loop header
LB: loop body
LE: loop exit
PB: predicated region body
PF: predicated region fallthrough
CT: control target
= control target key end

     0   :  { %6 = vsyncpa [#allocation3], 0  ;;  %s196_s0 = inlined_call_operand.hbm [shape: f32[1,1024], index: 0, kind: input, shape index: {}]   ;;  %s197_s1 = inlined_call_operand.hbm [shape: f32[2,1024], index: 1, kind: output, shape index: {}]  }
   0x1   :  { %7 = vsyncpa [#allocation4], 0  ;;  %s159_s6 = smov [#allocation2]   ;;  %s111_s10 = scalar_lea.hbm %s196_s0, 128 }
   0x2   :  { %s14_s7 = sshll.u32 %s159_s6, 4  ;;  %p112_p0 = scmp.ne.s32.totalorder %s196_s0, %s111_s10  ;;  %s15_s7 = int_to_ptr.vmem [resolvable:$true] %s14_s7 }
   0x3   :  { %p115_p1 = scmp.lt.u32.totalorder %s111_s10, %s196_s0 }
   0x5   :  { %p117_p2 = pnand %p115_p1, %p112_p0 }
   0x7   :  { %120 = shalt.err (!%p117_p2)
}
   0x8   :  { %s121_s15 = scalar_lea.vmem %s15_s7, 128  ;;  %p126_p4 = scmp.lt.s32.totalorder %s15_s7, %s15_s7 }
   0x9   :  { %p122_p3 = scmp.ne.s32.totalorder %s15_s7, %s121_s15  ;;  %p127_p5 = scmp.lt.s32.totalorder %s121_s15, %s121_s15 }
   0xb   :  { %p128_p6 = por %p127_p5, %p126_p4 }
   0xd   :  { %p129_p7 = pnand %p128_p6, %p122_p3 }
   0xf   :  { %132 = shalt.err (!%p129_p7)
}
  0x10   :  { %17 = dma.hbm_to_vmem [thread:$0]  %s196_s0, 128, %s15_s7, [#allocation3]  }
  0x11   :  { %155 = dma.done.wait [#allocation3], 128  }
  0x12   :  { %156 = vsyncadd [#allocation3], 4294967168  ;;  %v23_v0 = vlaneseq  ;;  %v160_v1 = vmov 1983009808   ;;  %v21_v13 = vld [vmem:[#allocation2] sm:$0xff]  ;;  %s161_s0 = smov [#allocation5]  }
  0x13   :  { %v58_v2 = vunpack.c.l.s4 %v160_v1  ;;  %s99_s18 = sshll.u32 %s161_s0, 4  ;;  %s100_s18 = int_to_ptr.vmem [resolvable:$true] %s99_s18 }
  0x14   :  { %v24_v3 = vshrl.u32 %v23_v0, 7  ;;  %s133_s19 = scalar_lea.vmem %s100_s18, 256  ;;  %p138_p9 = scmp.lt.s32.totalorder %s100_s18, %s100_s18 }
  0x15   :  { %v59_v4 = vunpack.c.0.s8 %v58_v2  ;;  %p134_p8 = scmp.ne.s32.totalorder %s100_s18, %s133_s19  ;;  %p139_p10 = scmp.lt.s32.totalorder %s133_s19, %s133_s19 }
  0x16   :  { %v25_v5 = vsub.s32 0, %v24_v3  ;;  %v29_v6 = vsub.s32 1, %v24_v3  ;;  %v33_v7 = vsub.s32 2, %v24_v3  ;;  %v37_v8 = vsub.s32 3, %v24_v3 }
  0x17   :  { %v41_v9 = vsub.s32 4, %v24_v3  ;;  %v45_v10 = vsub.s32 5, %v24_v3  ;;  %v49_v11 = vsub.s32 6, %v24_v3  ;;  %v53_v12 = vsub.s32 7, %v24_v3  ;;  %p140_p11 = por %p139_p10, %p138_p9 }
  0x18   :  { %v62_v14 = vsub.s32 %v59_v4, %v24_v3  ;;  %v26_v15 = vrot.slane %v21_v13, %v25_v5  ;;  %v30_v16 = vrot.slane %v21_v13, %v29_v6  ;;  %v34_v17 = vrot.slane %v21_v13, %v33_v7 }
  0x19   :  { %v38_v18 = vrot.slane %v21_v13, %v37_v8  ;;  %v42_v19 = vrot.slane %v21_v13, %v41_v9  ;;  %v46_v20 = vrot.slane %v21_v13, %v45_v10  ;;  %v50_v21 = vrot.slane %v21_v13, %v49_v11  ;;  %p141_p12 = pnand %p140_p11, %p134_p8 }
  0x1a   :  { %v54_v22 = vrot.slane %v21_v13, %v53_v12  ;;  %v55_v23 = vcombine.low %v26_v15, %v30_v16 }
  0x1b   :  { %v56_v24 = vcombine.low %v34_v17, %v38_v18  ;;  %v72_v25 = vcombine.low %v42_v19, %v46_v20 }
  0x1c   :  { %v73_v26 = vcombine.low %v50_v21, %v54_v22  ;;  %v63_v27 = vrot.slane %v55_v23, %v62_v14 }
  0x1d   :  { %v70_v28 = vrot.slane %v56_v24, %v62_v14  ;;  %v80_v29 = vrot.slane %v72_v25, %v62_v14 }
  0x1e   :  { %v87_v30 = vrot.slane %v73_v26, %v62_v14 }
  0x1f   :  { %v71_v31 = vcombine.low %v63_v27, %v70_v28 }
  0x20   :  { %v88_v32 = vcombine.low %v80_v29, %v87_v30 }
  0x21   :  { %91 = vst [vmem:[#allocation5] sm:$0xff] %v71_v31 }
  0x22   :  { %92 = vst [vmem:[#allocation5 + $0x8] sm:$0xff] %v88_v32 }
  0x23   :  { %144 = shalt.err (!%p141_p12)
}
  0x24   :  { %s145_s22 = scalar_lea.hbm %s197_s1, 256 }
  0x25   :  { %p146_p13 = scmp.ne.s32.totalorder %s197_s1, %s145_s22  ;;  %p149_p0 = scmp.lt.u32.totalorder %s145_s22, %s197_s1 }
  0x27   :  { %p151_p1 = pnand %p149_p0, %p146_p13 }
  0x29   :  { %154 = shalt.err (!%p151_p1)
}
  0x2a   :  { %102 = dma.vmem_to_hbm [thread:$0]  %s100_s18, 256, %s197_s1, [#allocation4]  }
  0x2b   :  { %157 = dma.done.wait [#allocation4], 256  }
  0x2c   :  { %158 = vsyncadd [#allocation4], 4294967040 }
  0x2d   :  { %106 = vsyncpa [#allocation3], 1 }
  0x2e   :  { %107 = vsyncpa [#allocation4], 1 }

</bundles_post_ra>
